<compile_context>
chip_gen: v7x
topology: tpu7x:2x2x1
jax: 0.10.0
libtpu: 0.0.40
codegen_flags: <defaults>
</compile_context>

<pallas_src>
from functools import partial

import jax
import jax.numpy as jnp
from jax.experimental import pallas as pl
from jax.experimental.pallas import tpu as pltpu

BN_EPS = 1e-5  # PyTorch BatchNorm2d default


# ----------------------------------------------------------------------------
# Fused kernel: entire adapter forward in one invocation.
# ----------------------------------------------------------------------------
def _fused_adapter_kernel(
    xa_ref, xb_ref,                     # (m_a, 3) bf16, (m_b, 3) bf16
    f0w_ref, f0b_ref,                   # (3, 8) bf16,  (1, 8) f32
    f1w_ref, f1b_ref,                   # (8, 16) bf16, (1, 16) f32
    r0w_ref, r0g_ref, r0beta_ref,       # (8, 32) bf16, (1, 32) f32, (1, 32) f32
    r1w_ref, r1g_ref, r1beta_ref,       # (16, 32) bf16, (1, 32) f32, (1, 32) f32
    out0_ref, out1_ref,                 # (m_a, 32) f32, (m_b, 32) f32
    *, m_a, m_b,
):
    def pw_relu(x_bf16, w_ref, b_ref):
        # 1x1 conv == channel matmul over flattened pixels, + bias + ReLU.
        y = jnp.dot(x_bf16, w_ref[...], preferred_element_type=jnp.float32)
        return jnp.maximum(y + b_ref[...], 0.0)

    def pw_bn_relu(x_bf16, w_ref, g_ref, beta_ref, m):
        # Conv2d(bias=False) + BatchNorm2d (train-mode batch stats, biased
        # variance) + ReLU.  Single-pass stats: var = E[y^2] - E[y]^2.
        y = jnp.dot(x_bf16, w_ref[...], preferred_element_type=jnp.float32)
        inv_m = 1.0 / m
        mean = jnp.sum(y, axis=0, keepdims=True) * inv_m
        mean_sq = jnp.sum(y * y, axis=0, keepdims=True) * inv_m
        var = mean_sq - mean * mean
        y_hat = (y - mean) * jax.lax.rsqrt(var + BN_EPS)
        return jnp.maximum(y_hat * g_ref[...] + beta_ref[...], 0.0)

    # ---- level 0: features[0] -> reducers[0] -> output "0" ------------------
    y0 = pw_relu(xa_ref[...], f0w_ref, f0b_ref)                       # (m_a, 8)
    out0_ref[...] = pw_bn_relu(
        y0.astype(jnp.bfloat16), r0w_ref, r0g_ref, r0beta_ref, m_a
    ).astype(out0_ref.dtype)

    # ---- level 1: features[1] -> reducers[1] -> output "1" ------------------
    # features[0] recomputed on the 4x-subsampled pixels (subsampling commutes
    # with the per-pixel conv+bias+ReLU), so no strided gather of y0 is needed.
    y0b = pw_relu(xb_ref[...], f0w_ref, f0b_ref)                      # (m_b, 8)
    y1 = pw_relu(y0b.astype(jnp.bfloat16), f1w_ref, f1b_ref)          # (m_b, 16)
    out1_ref[...] = pw_bn_relu(
        y1.astype(jnp.bfloat16), r1w_ref, r1g_ref, r1beta_ref, m_b
    ).astype(out1_ref.dtype)


def _vmem_spec():
    # Whole array resident in VMEM, no blocking / no grid.
    return pl.BlockSpec(memory_space=pltpu.MemorySpace.VMEM)


# ----------------------------------------------------------------------------
# Deterministic synthetic parameters (shapes implied by the module's __init__).
# ----------------------------------------------------------------------------
def init_params(key):
    ks = jax.random.split(key, 8)

    def conv_w(k, cin, cout, scale=0.1):
        return scale * jax.random.normal(k, (cin, cout), jnp.float32)

    return {
        "feat0_w": conv_w(ks[0], 3, 8),
        "feat0_b": 0.1 * jax.random.normal(ks[1], (1, 8), jnp.float32),
        "feat1_w": conv_w(ks[2], 8, 16),
        "feat1_b": 0.1 * jax.random.normal(ks[3], (1, 16), jnp.float32),
        "red0_w": conv_w(ks[4], 8, 32),
        "red0_g": jnp.ones((1, 32), jnp.float32),
        "red0_beta": jnp.zeros((1, 32), jnp.float32),
        "red1_w": conv_w(ks[5], 16, 32),
        "red1_g": jnp.ones((1, 32), jnp.float32),
        "red1_beta": jnp.zeros((1, 32), jnp.float32),
        # `extra` params kept for structural fidelity; the reference forward
        # discards extra's output, so they are dead and never touched.
        "extra0_w": conv_w(ks[6], 32, 64),
        "extra0_b": jnp.zeros((1, 64), jnp.float32),
    }


# ----------------------------------------------------------------------------
# Forward: one pallas_call, jitted wrapper.
# ----------------------------------------------------------------------------
@jax.jit
def lite_resnet_adapter_forward(params, x_nchw):
    """Pallas equivalent of LiteResnetAdapter.forward (dict of NCHW tensors)."""
    N, _, H, W = x_nchw.shape
    ha, wa = H // 2, W // 2          # after features[0] downsample
    hb, wb = H // 4, W // 4          # after features[1] downsample
    m_a, m_b = N * ha * wa, N * hb * wb

    x = jnp.transpose(x_nchw, (0, 2, 3, 1))                     # NCHW -> NHWC
    xa = x[:, ::2, ::2, :].reshape(m_a, 3).astype(jnp.bfloat16)  # level-0 pixels
    xb = x[:, ::4, ::4, :].reshape(m_b, 3).astype(jnp.bfloat16)  # level-1 pixels

    bf16 = lambda w: w.astype(jnp.bfloat16)

    out0, out1 = pl.pallas_call(
        partial(_fused_adapter_kernel, m_a=float(m_a), m_b=float(m_b)),
        out_shape=(
            jax.ShapeDtypeStruct((m_a, 32), jnp.float32),
            jax.ShapeDtypeStruct((m_b, 32), jnp.float32),
        ),
        in_specs=[_vmem_spec()] * 12,
        out_specs=(_vmem_spec(), _vmem_spec()),
    )(
        xa, xb,
        bf16(params["feat0_w"]), params["feat0_b"],
        bf16(params["feat1_w"]), params["feat1_b"],
        bf16(params["red0_w"]), params["red0_g"], params["red0_beta"],
        bf16(params["red1_w"]), params["red1_g"], params["red1_beta"],
    )

    # `extra` would run on output[-1] here, but its result is not returned by
    # the reference forward -> dead code under jit, intentionally elided.

    out0 = jnp.transpose(out0.reshape(N, ha, wa, 32), (0, 3, 1, 2))
    out1 = jnp.transpose(out1.reshape(N, hb, wb, 32), (0, 3, 1, 2))
    return {"0": out0, "1": out1}


# ----------------------------------------------------------------------------
# Pure-JAX f32 reference (mirrors the original module's op order, including the
# downsample applied to the features[0] OUTPUT) for numerical validation.
# ----------------------------------------------------------------------------
def _reference_forward(params, x_nchw):
    x = jnp.transpose(x_nchw, (0, 2, 3, 1))

    def pw(x4, w, b):
        y = jnp.einsum("nhwc,cd->nhwd", x4, w) + b.reshape(1, 1, 1, -1)
        return jnp.maximum(y, 0.0)

    def red(x4, w, g, beta):
        y = jnp.einsum("nhwc,cd->nhwd", x4, w)
        mean = jnp.mean(y, axis=(0, 1, 2), keepdims=True)
        var = jnp.mean((y - mean) ** 2, axis=(0, 1, 2), keepdims=True)
        y = (y - mean) * jax.lax.rsqrt(var + BN_EPS)
        return jnp.maximum(y * g.reshape(1, 1, 1, -1) + beta.reshape(1, 1, 1, -1), 0.0)

    xd = x[:, ::2, ::2, :]
    y0 = pw(xd, params["feat0_w"], params["feat0_b"])
    o0 = red(y0, params["red0_w"], params["red0_g"], params["red0_beta"])
    y0d = y0[:, ::2, ::2, :]
    y1 = pw(y0d, params["feat1_w"], params["feat1_b"])
    o1 = red(y1, params["red1_w"], params["red1_g"], params["red1_beta"])
    return {"0": jnp.transpose(o0, (0, 3, 1, 2)),
            "1": jnp.transpose(o1, (0, 3, 1, 2))}


if __name__ == "__main__":
    key = jax.random.PRNGKey(0)
    pkey, xkey = jax.random.split(key)
    params = init_params(pkey)

    # Small input consistent with the module: batch=2, RGB, 16x16 spatial (NCHW).
    x = jax.random.uniform(xkey, (2, 3, 16, 16), dtype=jnp.float32)

    out = lite_resnet_adapter_forward(params, x)
    out = jax.block_until_ready(out)

    assert out["0"].shape == (2, 32, 8, 8), out["0"].shape
    assert out["1"].shape == (2, 32, 4, 4), out["1"].shape
    assert bool(jnp.all(jnp.isfinite(out["0"]))) and bool(jnp.all(jnp.isfinite(out["1"])))

    # Numerical check vs f32 reference (kernel uses bf16 MXU inputs -> loose tol).
    ref = _reference_forward(params, x)
    assert bool(jnp.allclose(out["0"], ref["0"], atol=0.1, rtol=0.1)), \
        float(jnp.max(jnp.abs(out["0"] - ref["0"])))
    assert bool(jnp.allclose(out["1"], ref["1"], atol=0.1, rtol=0.1)), \
        float(jnp.max(jnp.abs(out["1"] - ref["1"])))

    print("KERNEL_OK")
</pallas_src>

<mosaic_0001>
module attributes {stable_mosaic.version = 11 : i64} {
  func.func @_fused_adapter_kernel(%arg0: memref<128x3xbf16, #tpu.memory_space<vmem>>, %arg1: memref<32x3xbf16, #tpu.memory_space<vmem>>, %arg2: memref<3x8xbf16, #tpu.memory_space<vmem>>, %arg3: memref<1x8xf32, #tpu.memory_space<vmem>>, %arg4: memref<8x16xbf16, #tpu.memory_space<vmem>>, %arg5: memref<1x16xf32, #tpu.memory_space<vmem>>, %arg6: memref<8x32xbf16, #tpu.memory_space<vmem>>, %arg7: memref<1x32xf32, #tpu.memory_space<vmem>>, %arg8: memref<1x32xf32, #tpu.memory_space<vmem>>, %arg9: memref<16x32xbf16, #tpu.memory_space<vmem>>, %arg10: memref<1x32xf32, #tpu.memory_space<vmem>>, %arg11: memref<1x32xf32, #tpu.memory_space<vmem>>, %arg12: memref<128x32xf32, #tpu.memory_space<vmem>>, %arg13: memref<32x32xf32, #tpu.memory_space<vmem>>) attributes {dimension_semantics = [], scalar_prefetch = 0 : i64, scratch_operands = 0 : i64, tpu.core_type = #tpu.core_type<tc>} {
    %c0 = arith.constant 0 : index
    %c0_0 = arith.constant 0 : index
    %0 = vector.load %arg0[%c0, %c0_0] : memref<128x3xbf16, #tpu.memory_space<vmem>>, vector<128x3xbf16>
    %c0_1 = arith.constant 0 : index
    %c0_2 = arith.constant 0 : index
    %1 = vector.load %arg2[%c0_1, %c0_2] : memref<3x8xbf16, #tpu.memory_space<vmem>>, vector<3x8xbf16>
    %cst = arith.constant dense<0.000000e+00> : vector<128x8xf32>
    %2 = tpu.matmul %0, %1, %cst {dimension_numbers = #tpu.dot_dimension_numbers<[1], [0], [0], [1], [0, 0, 1, 1], [], []>} : vector<128x3xbf16>, vector<3x8xbf16>, vector<128x8xf32> -> vector<128x8xf32>
    %c0_3 = arith.constant 0 : index
    %c0_4 = arith.constant 0 : index
    %3 = vector.load %arg3[%c0_3, %c0_4] : memref<1x8xf32, #tpu.memory_space<vmem>>, vector<1x8xf32>
    %4 = vector.broadcast %3 : vector<1x8xf32> to vector<128x8xf32>
    %5 = arith.addf %2, %4 : vector<128x8xf32>
    %cst_5 = arith.constant 0.000000e+00 : f32
    %6 = vector.broadcast %cst_5 : f32 to vector<128x8xf32>
    %7 = arith.maximumf %5, %6 : vector<128x8xf32>
    %8 = arith.truncf %7 : vector<128x8xf32> to vector<128x8xbf16>
    %c0_6 = arith.constant 0 : index
    %c0_7 = arith.constant 0 : index
    %9 = vector.load %arg6[%c0_6, %c0_7] : memref<8x32xbf16, #tpu.memory_space<vmem>>, vector<8x32xbf16>
    %cst_8 = arith.constant dense<0.000000e+00> : vector<128x32xf32>
    %10 = tpu.matmul %8, %9, %cst_8 {dimension_numbers = #tpu.dot_dimension_numbers<[1], [0], [0], [1], [0, 0, 1, 1], [], []>} : vector<128x8xbf16>, vector<8x32xbf16>, vector<128x32xf32> -> vector<128x32xf32>
    %cst_9 = arith.constant dense<0.000000e+00> : vector<32xf32>
    %11 = vector.multi_reduction <add>, %10, %cst_9 [0] : vector<128x32xf32> to vector<32xf32>
    %12 = vector.shape_cast %11 : vector<32xf32> to vector<1x32xf32>
    %cst_10 = arith.constant 7.812500e-03 : f32
    %13 = vector.broadcast %cst_10 : f32 to vector<1x32xf32>
    %14 = arith.mulf %12, %13 : vector<1x32xf32>
    %15 = arith.mulf %10, %10 : vector<128x32xf32>
    %cst_11 = arith.constant dense<0.000000e+00> : vector<32xf32>
    %16 = vector.multi_reduction <add>, %15, %cst_11 [0] : vector<128x32xf32> to vector<32xf32>
    %17 = vector.shape_cast %16 : vector<32xf32> to vector<1x32xf32>
    %cst_12 = arith.constant 7.812500e-03 : f32
    %18 = vector.broadcast %cst_12 : f32 to vector<1x32xf32>
    %19 = arith.mulf %17, %18 : vector<1x32xf32>
    %20 = arith.mulf %14, %14 : vector<1x32xf32>
    %21 = arith.subf %19, %20 : vector<1x32xf32>
    %22 = vector.broadcast %14 : vector<1x32xf32> to vector<128x32xf32>
    %23 = arith.subf %10, %22 : vector<128x32xf32>
    %cst_13 = arith.constant 9.99999974E-6 : f32
    %24 = vector.broadcast %cst_13 : f32 to vector<1x32xf32>
    %25 = arith.addf %21, %24 : vector<1x32xf32>
    %26 = math.rsqrt %25 : vector<1x32xf32>
    %27 = vector.broadcast %26 : vector<1x32xf32> to vector<128x32xf32>
    %28 = arith.mulf %23, %27 : vector<128x32xf32>
    %c0_14 = arith.constant 0 : index
    %c0_15 = arith.constant 0 : index
    %29 = vector.load %arg7[%c0_14, %c0_15] : memref<1x32xf32, #tpu.memory_space<vmem>>, vector<1x32xf32>
    %30 = vector.broadcast %29 : vector<1x32xf32> to vector<128x32xf32>
    %31 = arith.mulf %28, %30 : vector<128x32xf32>
    %c0_16 = arith.constant 0 : index
    %c0_17 = arith.constant 0 : index
    %32 = vector.load %arg8[%c0_16, %c0_17] : memref<1x32xf32, #tpu.memory_space<vmem>>, vector<1x32xf32>
    %33 = vector.broadcast %32 : vector<1x32xf32> to vector<128x32xf32>
    %34 = arith.addf %31, %33 : vector<128x32xf32>
    %cst_18 = arith.constant 0.000000e+00 : f32
    %35 = vector.broadcast %cst_18 : f32 to vector<128x32xf32>
    %36 = arith.maximumf %34, %35 : vector<128x32xf32>
    %c0_19 = arith.constant 0 : index
    %c0_20 = arith.constant 0 : index
    %37 = vector.load %arg12[%c0_19, %c0_20] : memref<128x32xf32, #tpu.memory_space<vmem>>, vector<128x32xf32>
    tpu.vector_store %arg12[%c0_19, %c0_20], %36 {strides = array<i32>} : memref<128x32xf32, #tpu.memory_space<vmem>>, vector<128x32xf32>,
    %c0_21 = arith.constant 0 : index
    %c0_22 = arith.constant 0 : index
    %38 = vector.load %arg1[%c0_21, %c0_22] : memref<32x3xbf16, #tpu.memory_space<vmem>>, vector<32x3xbf16>
    %c0_23 = arith.constant 0 : index
    %c0_24 = arith.constant 0 : index
    %39 = vector.load %arg2[%c0_23, %c0_24] : memref<3x8xbf16, #tpu.memory_space<vmem>>, vector<3x8xbf16>
    %cst_25 = arith.constant dense<0.000000e+00> : vector<32x8xf32>
    %40 = tpu.matmul %38, %39, %cst_25 {dimension_numbers = #tpu.dot_dimension_numbers<[1], [0], [0], [1], [0, 0, 1, 1], [], []>} : vector<32x3xbf16>, vector<3x8xbf16>, vector<32x8xf32> -> vector<32x8xf32>
    %c0_26 = arith.constant 0 : index
    %c0_27 = arith.constant 0 : index
    %41 = vector.load %arg3[%c0_26, %c0_27] : memref<1x8xf32, #tpu.memory_space<vmem>>, vector<1x8xf32>
    %42 = vector.broadcast %41 : vector<1x8xf32> to vector<32x8xf32>
    %43 = arith.addf %40, %42 : vector<32x8xf32>
    %cst_28 = arith.constant 0.000000e+00 : f32
    %44 = vector.broadcast %cst_28 : f32 to vector<32x8xf32>
    %45 = arith.maximumf %43, %44 : vector<32x8xf32>
    %46 = arith.truncf %45 : vector<32x8xf32> to vector<32x8xbf16>
    %c0_29 = arith.constant 0 : index
    %c0_30 = arith.constant 0 : index
    %47 = vector.load %arg4[%c0_29, %c0_30] : memref<8x16xbf16, #tpu.memory_space<vmem>>, vector<8x16xbf16>
    %cst_31 = arith.constant dense<0.000000e+00> : vector<32x16xf32>
    %48 = tpu.matmul %46, %47, %cst_31 {dimension_numbers = #tpu.dot_dimension_numbers<[1], [0], [0], [1], [0, 0, 1, 1], [], []>} : vector<32x8xbf16>, vector<8x16xbf16>, vector<32x16xf32> -> vector<32x16xf32>
    %c0_32 = arith.constant 0 : index
    %c0_33 = arith.constant 0 : index
    %49 = vector.load %arg5[%c0_32, %c0_33] : memref<1x16xf32, #tpu.memory_space<vmem>>, vector<1x16xf32>
    %50 = vector.broadcast %49 : vector<1x16xf32> to vector<32x16xf32>
    %51 = arith.addf %48, %50 : vector<32x16xf32>
    %cst_34 = arith.constant 0.000000e+00 : f32
    %52 = vector.broadcast %cst_34 : f32 to vector<32x16xf32>
    %53 = arith.maximumf %51, %52 : vector<32x16xf32>
    %54 = arith.truncf %53 : vector<32x16xf32> to vector<32x16xbf16>
    %c0_35 = arith.constant 0 : index
    %c0_36 = arith.constant 0 : index
    %55 = vector.load %arg9[%c0_35, %c0_36] : memref<16x32xbf16, #tpu.memory_space<vmem>>, vector<16x32xbf16>
    %cst_37 = arith.constant dense<0.000000e+00> : vector<32x32xf32>
    %56 = tpu.matmul %54, %55, %cst_37 {dimension_numbers = #tpu.dot_dimension_numbers<[1], [0], [0], [1], [0, 0, 1, 1], [], []>} : vector<32x16xbf16>, vector<16x32xbf16>, vector<32x32xf32> -> vector<32x32xf32>
    %cst_38 = arith.constant dense<0.000000e+00> : vector<32xf32>
    %57 = vector.multi_reduction <add>, %56, %cst_38 [0] : vector<32x32xf32> to vector<32xf32>
    %58 = vector.shape_cast %57 : vector<32xf32> to vector<1x32xf32>
    %cst_39 = arith.constant 3.125000e-02 : f32
    %59 = vector.broadcast %cst_39 : f32 to vector<1x32xf32>
    %60 = arith.mulf %58, %59 : vector<1x32xf32>
    %61 = arith.mulf %56, %56 : vector<32x32xf32>
    %cst_40 = arith.constant dense<0.000000e+00> : vector<32xf32>
    %62 = vector.multi_reduction <add>, %61, %cst_40 [0] : vector<32x32xf32> to vector<32xf32>
    %63 = vector.shape_cast %62 : vector<32xf32> to vector<1x32xf32>
    %cst_41 = arith.constant 3.125000e-02 : f32
    %64 = vector.broadcast %cst_41 : f32 to vector<1x32xf32>
    %65 = arith.mulf %63, %64 : vector<1x32xf32>
    %66 = arith.mulf %60, %60 : vector<1x32xf32>
    %67 = arith.subf %65, %66 : vector<1x32xf32>
    %68 = vector.broadcast %60 : vector<1x32xf32> to vector<32x32xf32>
    %69 = arith.subf %56, %68 : vector<32x32xf32>
    %cst_42 = arith.constant 9.99999974E-6 : f32
    %70 = vector.broadcast %cst_42 : f32 to vector<1x32xf32>
    %71 = arith.addf %67, %70 : vector<1x32xf32>
    %72 = math.rsqrt %71 : vector<1x32xf32>
    %73 = vector.broadcast %72 : vector<1x32xf32> to vector<32x32xf32>
    %74 = arith.mulf %69, %73 : vector<32x32xf32>
    %c0_43 = arith.constant 0 : index
    %c0_44 = arith.constant 0 : index
    %75 = vector.load %arg10[%c0_43, %c0_44] : memref<1x32xf32, #tpu.memory_space<vmem>>, vector<1x32xf32>
    %76 = vector.broadcast %75 : vector<1x32xf32> to vector<32x32xf32>
    %77 = arith.mulf %74, %76 : vector<32x32xf32>
    %c0_45 = arith.constant 0 : index
    %c0_46 = arith.constant 0 : index
    %78 = vector.load %arg11[%c0_45, %c0_46] : memref<1x32xf32, #tpu.memory_space<vmem>>, vector<1x32xf32>
    %79 = vector.broadcast %78 : vector<1x32xf32> to vector<32x32xf32>
    %80 = arith.addf %77, %79 : vector<32x32xf32>
    %cst_47 = arith.constant 0.000000e+00 : f32
    %81 = vector.broadcast %cst_47 : f32 to vector<32x32xf32>
    %82 = arith.maximumf %80, %81 : vector<32x32xf32>
    %c0_48 = arith.constant 0 : index
    %c0_49 = arith.constant 0 : index
    %83 = vector.load %arg13[%c0_48, %c0_49] : memref<32x32xf32, #tpu.memory_space<vmem>>, vector<32x32xf32>
    tpu.vector_store %arg13[%c0_48, %c0_49], %82 {strides = array<i32>} : memref<32x32xf32, #tpu.memory_space<vmem>>, vector<32x32xf32>,
    return
  }
}

</mosaic_0001>

<bundles_post_ra>
// kernel: lite_resnet_adapter_forward.1
= control target key start
LH: loop header
LB: loop body
LE: loop exit
PB: predicated region body
PF: predicated region fallthrough
CT: control target
= control target key end

     0   :  { %19 = vsyncpa [#allocation3], 0  ;;  %vm135_vm0 = vcmask 1040384   ;;  %vm136_vm1 = vcmask 1041408   ;;  %v1116_v2 = vmov 65535   ;;  %vm110_vm2 = vcmask 23552   ;;  %s1482_s0 = inlined_call_operand.vmem [shape: bf16[128,3], index: 0, kind: input, shape index: {}]   ;;  %s1483_s1 = inlined_call_operand.vmem [shape: bf16[32,3], index: 1, kind: input, shape index: {}]   ;;  %s1484_s2 = inlined_call_operand.vmem [shape: bf16[3,8], index: 2, kind: input, shape index: {}]   ;;  %s1485_s3 = inlined_call_operand.vmem [shape: f32[1,8], index: 3, kind: input, shape index: {}]   ;;  %s1486_s4 = inlined_call_operand.vmem [shape: bf16[8,16], index: 4, kind: input, shape index: {}]   ;;  %s1487_s5 = inlined_call_operand.vmem [shape: f32[1,16], index: 5, kind: input, shape index: {}]   ;;  %s1488_s6 = inlined_call_operand.vmem [shape: bf16[8,32], index: 6, kind: input, shape index: {}]   ;;  %s1489_s7 = inlined_call_operand.vmem [shape: f32[1,32], index: 7, kind: input, shape index: {}]   ;;  %s1490_s8 = inlined_call_operand.vmem [shape: f32[1,32], index: 8, kind: input, shape index: {}]   ;;  %s1491_s9 = inlined_call_operand.vmem [shape: bf16[16,32], index: 9, kind: input, shape index: {}]   ;;  %s1492_s10 = inlined_call_operand.vmem [shape: f32[1,32], index: 10, kind: input, shape index: {}]   ;;  %s1493_s11 = inlined_call_operand.vmem [shape: f32[1,32], index: 11, kind: input, shape index: {}]   ;;  %s1494_s12 = inlined_call_operand.hbm [shape: f32[128,32], index: 12, kind: output, shape index: {0}]   ;;  %s1495_s13 = inlined_call_operand.hbm [shape: f32[32,32], index: 13, kind: output, shape index: {1}]  }
   0x1   :  { %v62_v0 = vld [vmem:[%s1484_s2] sm:$0x3]  ;;  %v137_v3 = vsel %vm135_vm0, 4294967295, %v1116_v2  ;;  %v1054_v8 = vld [vmem:[%s1482_s0 + $0x8] sm:$0xff]   ;;  %v1055_v9 = vld [vmem:[%s1482_s0 + $0x10] sm:$0xff]  }
   0x2   :  { %v1053_v1 = vld [vmem:[%s1482_s0] sm:$0xff]   ;;  %v138_v5 = vsel %vm136_vm1, %v137_v3, 0 }
   0x3   :  { %v601_v4 = vld [vmem:[%s1484_s2] sm:$0x3]  ;;  %994 = vmatprep.mubr.msk.bf16.mxu0 %vm110_vm2, %v1053_v1  ;;  %v140_v6 = vand.u32 %v138_v5, %v62_v0 }
   0x4   :  { %v626_v7 = vand.u32 %v601_v4, %v138_v5 }
   0x5   :  { %992 = vmatprep.subr.bf16.mxu0 %v140_v6 }
   0x6   :  { %993 = vmatpush3.bf16.msra.mxu0 %v140_v6 }
   0x7   :  { %1028 = vmatprep.subr.bf16.mxu0 %v626_v7 }
   0x9   :  { %995 = vmatmul.mubr.msk.bf16.vlgmr.msra.gmra.mrb[0].mxu0 %vm110_vm2, %v1054_v8 }
   0xa   :  { %1029 = vmatpush3.bf16.msra.mxu0 %v626_v7  ;;  %998 = vmatprep.mubr.msk.bf16.mxu0 %vm110_vm2, %v1055_v9 }
   0xb   :  { %20 = vsyncpa [#allocation5], 0  ;;  %v1056_v10 = vld [vmem:[%s1482_s0 + $0x18] sm:$0xff]   ;;  %v1057_v11 = vld [vmem:[%s1482_s0 + $0x20] sm:$0xff]   ;;  %vm289_vm3 = vcmask 1043456   ;;  %vm264_vm4 = vcmask 64512  }
   0xc   :  { %v1058_v12 = vld [vmem:[%s1482_s0 + $0x28] sm:$0xff]   ;;  %v1059_v13 = vld [vmem:[%s1482_s0 + $0x30] sm:$0xff]   ;;  %v1060_v14 = vld [vmem:[%s1482_s0 + $0x38] sm:$0xff]   ;;  %vm390_vm5 = vcmask 261120   ;;  %vm763_vm6 = vcmask 130048  }
   0xd   :  { %v1061_v15 = vld [vmem:[%s1483_s1] sm:$0xff]   ;;  %v1062_v16 = vld [vmem:[%s1483_s1 + $0x8] sm:$0xff]  }
   0xe   :  { %v263_v17 = vld [vmem:[%s1488_s6] sm:$0xf] }
   0xf   :  { %1046 = vmatprep.subr.msk.bf16.mxu1 %vm289_vm3, %v263_v17  ;;  %v291_v18 = vsel %vm289_vm3, %v263_v17, 0  ;;  %v683_v19 = vld [vmem:[%s1486_s4] sm:$0xf] }
  0x10   :  { %1011 = vmatpush3.bf16.msra.mxu1 %v291_v18  ;;  %v698_v20 = vsel %vm289_vm3, %v683_v19, 0  ;;  %v1246_v21 = vld [vmem:[%s1485_s3] ss:$0 sm:$0xff] }
  0x11   :  { %999 = vmatmul.mubr.msk.bf16.gmra.mrb[4].mxu0 %vm110_vm2, %v1056_v10  ;;  %1047 = vmatprep.subr.msk.bf16.mxu1 %vm289_vm3, %v683_v19 }
  0x12   :  { %1002 = vmatprep.mubr.msk.bf16.mxu0 %vm110_vm2, %v1057_v11 }
  0x19   :  { %1003 = vmatmul.mubr.msk.bf16.gmra.mrb[8].mxu0 %vm110_vm2, %v1058_v12 }
  0x1a   :  { %1006 = vmatprep.mubr.msk.bf16.mxu0 %vm110_vm2, %v1059_v13 }
  0x21   :  { %1007 = vmatmul.mubr.msk.bf16.gmra.mrb[12].mxu0 %vm110_vm2, %v1060_v14 }
  0x22   :  { %1030 = vmatprep.mubr.msk.bf16.mxu0 %vm110_vm2, %v1061_v15 }
  0x29   :  { %1031 = vmatmul.mubr.msk.bf16.vlgmr.msra.gmra.mrb[16].mxu0 %vm110_vm2, %v1062_v16 }
  0xdc   :  { %v996_v22 = vpop.f32.mrb[0].mxu0 }
  0xdd   :  { %v185_v23 = vadd.f32 %v996_v22, %v1246_v21  ;;  %v176_v24 = vpop.f32.mrb[1].mxu0 }
  0xde   :  { %v177_v25 = vadd.f32 %v1246_v21, %v176_v24  ;;  %v997_v26 = vpop.f32.mrb[2].mxu0 }
  0xdf   :  { %v188_v27 = vadd.f32 %v997_v26, %v1246_v21  ;;  %v179_v28 = vpop.f32.mrb[3].mxu0  ;;  %v241_v30 = vmax.f32 %v185_v23, 0.0 }
  0xe0   :  { %v180_v29 = vadd.f32 %v1246_v21, %v179_v28  ;;  %v239_v32 = vmax.f32 %v177_v25, 0.0 }
  0xe1   :  { %v242_v31 = vmax.f32 %v188_v27, 0.0 }
  0xe2   :  { %v240_v33 = vmax.f32 %v180_v29, 0.0  ;;  %v1063_v29 = vld [vmem:[%s1491_s9] sm:$0xff]  }
  0xe3   :  { %v256_v34 = vpack.c.bf16 %v242_v31, %v241_v30  ;;  %1040 = vmatprep.subr.bf16.mxu0 %v1063_v29 }
  0xe4   :  { %v1000_v35 = vpop.f32.mrb[4].mxu0  ;;  %v255_v36 = vpack.c.bf16 %v240_v33, %v239_v32  ;;  %1041 = vmatpush3.bf16.msra.mxu0 %v1063_v29 }
  0xe5   :  { %v201_v37 = vadd.f32 %v1000_v35, %v1246_v21  ;;  %v192_v38 = vpop.f32.mrb[5].mxu0 }
  0xe6   :  { %v193_v39 = vadd.f32 %v1246_v21, %v192_v38  ;;  %v1001_v40 = vpop.f32.mrb[6].mxu0  ;;  %1012 = vmatprep.mubr.msk.bf16.mxu1 %vm264_vm4, %v255_v36 }
  0xe7   :  { %v204_v41 = vadd.f32 %v1001_v40, %v1246_v21  ;;  %v195_v42 = vpop.f32.mrb[7].mxu0  ;;  %1013 = vmatmul.mubr.msk.bf16.vlgmr.msra.gmra.mrb[0].mxu1 %vm264_vm4, %v256_v34  ;;  %v245_v44 = vmax.f32 %v201_v37, 0.0 }
  0xe8   :  { %v196_v43 = vadd.f32 %v1246_v21, %v195_v42  ;;  %1035 = vmatpush3.bf16.msra.mxu1 %v698_v20  ;;  %v243_v46 = vmax.f32 %v193_v39, 0.0 }
  0xe9   :  { %v246_v45 = vmax.f32 %v204_v41, 0.0 }
  0xea   :  { %v244_v47 = vmax.f32 %v196_v43, 0.0 }
  0xeb   :  { %v258_v48 = vpack.c.bf16 %v246_v45, %v245_v44 }
  0xec   :  { %v257_v49 = vpack.c.bf16 %v244_v47, %v243_v46  ;;  %v1004_v50 = vpop.f32.mrb[8].mxu0 }
  0xed   :  { %v217_v51 = vadd.f32 %v1004_v50, %v1246_v21  ;;  %v208_v52 = vpop.f32.mrb[9].mxu0 }
  0xee   :  { %v209_v53 = vadd.f32 %v1246_v21, %v208_v52  ;;  %v1005_v54 = vpop.f32.mrb[10].mxu0  ;;  %1016 = vmatprep.mubr.msk.bf16.mxu1 %vm264_vm4, %v257_v49 }
  0xef   :  { %v220_v55 = vadd.f32 %v1005_v54, %v1246_v21  ;;  %v211_v56 = vpop.f32.mrb[11].mxu0  ;;  %1017 = vmatmul.mubr.msk.bf16.gmra.mrb[4].mxu1 %vm264_vm4, %v258_v48  ;;  %v249_v58 = vmax.f32 %v217_v51, 0.0 }
  0xf0   :  { %v212_v57 = vadd.f32 %v1246_v21, %v211_v56  ;;  %v247_v60 = vmax.f32 %v209_v53, 0.0 }
  0xf1   :  { %v250_v59 = vmax.f32 %v220_v55, 0.0 }
  0xf2   :  { %v248_v61 = vmax.f32 %v212_v57, 0.0 }
  0xf3   :  { %v260_v62 = vpack.c.bf16 %v250_v59, %v249_v58 }
  0xf4   :  { %v259_v63 = vpack.c.bf16 %v248_v61, %v247_v60  ;;  %v1008_v0 = vpop.f32.mrb[12].mxu0 }
  0xf5   :  { %v233_v1 = vadd.f32 %v1008_v0, %v1246_v21  ;;  %v224_v2 = vpop.f32.mrb[13].mxu0 }
  0xf6   :  { %v225_v3 = vadd.f32 %v1246_v21, %v224_v2  ;;  %v1009_v4 = vpop.f32.mrb[14].mxu0  ;;  %1020 = vmatprep.mubr.msk.bf16.mxu1 %vm264_vm4, %v259_v63 }
  0xf7   :  { %v236_v5 = vadd.f32 %v1009_v4, %v1246_v21  ;;  %v227_v6 = vpop.f32.mrb[15].mxu0  ;;  %1021 = vmatmul.mubr.msk.bf16.gmra.mrb[8].mxu1 %vm264_vm4, %v260_v62  ;;  %v253_v8 = vmax.f32 %v233_v1, 0.0 }
  0xf8   :  { %v228_v7 = vadd.f32 %v1246_v21, %v227_v6  ;;  %v251_v10 = vmax.f32 %v225_v3, 0.0 }
  0xf9   :  { %v254_v9 = vmax.f32 %v236_v5, 0.0 }
  0xfa   :  { %v252_v11 = vmax.f32 %v228_v7, 0.0 }
  0xfb   :  { %v262_v12 = vpack.c.bf16 %v254_v9, %v253_v8 }
  0xfc   :  { %v261_v13 = vpack.c.bf16 %v252_v11, %v251_v10  ;;  %v1032_v14 = vpop.f32.mrb[16].mxu0 }
  0xfd   :  { %v671_v15 = vadd.f32 %v1032_v14, %v1246_v21  ;;  %v662_v16 = vpop.f32.mrb[17].mxu0 }
  0xfe   :  { %v663_v17 = vadd.f32 %v1246_v21, %v662_v16  ;;  %1024 = vmatprep.mubr.msk.bf16.mxu1 %vm264_vm4, %v261_v13  ;;  %v1033_v18 = vpop.f32.mrb[18].mxu0 }
  0xff   :  { %v674_v19 = vadd.f32 %v1033_v18, %v1246_v21  ;;  %1025 = vmatmul.mubr.msk.bf16.gmra.mrb[12].mxu1 %vm264_vm4, %v262_v12  ;;  %v665_v20 = vpop.f32.mrb[19].mxu0  ;;  %v679_v23 = vmax.f32 %v671_v15, 0.0 }
 0x100   :  { %v666_v22 = vadd.f32 %v1246_v21, %v665_v20  ;;  %v677_v25 = vmax.f32 %v663_v17, 0.0 }
 0x101   :  { %v680_v24 = vmax.f32 %v674_v19, 0.0 }
 0x102   :  { %v678_v26 = vmax.f32 %v666_v22, 0.0 }
 0x103   :  { %v682_v27 = vpack.c.bf16 %v680_v24, %v679_v23 }
 0x104   :  { %v681_v28 = vpack.c.bf16 %v678_v26, %v677_v25 }
 0x106   :  { %1036 = vmatprep.mubr.msk.bf16.mxu1 %vm264_vm4, %v681_v28 }
 0x107   :  { %1037 = vmatmul.mubr.msk.bf16.vlgmr.msra.gmra.mrb[16].mxu1 %vm264_vm4, %v682_v27 }
 0x1ba   :  { %v1281_v30 = vpop.f32.mrb[0].mxu1 }
 0x1bb   :  { %v1283_v21 = vpop.f32.mrb[1].mxu1  ;;  %v431_v34 = vmul.f32 %v1281_v30, %v1281_v30  ;;  %v394_v39 = vsel %vm390_vm5, %v1281_v30, 0.0 }
 0x1bc   :  { %v429_v31 = vmul.f32 %v1283_v21, %v1283_v21  ;;  %v1287_v32 = vpop.f32.mrb[2].mxu1  ;;  %v391_v35 = vsel %vm390_vm5, %v1283_v21, 0.0 }
 0x1bd   :  { %v1289_v33 = vpop.f32.mrb[3].mxu1  ;;  %v432_v41 = vmul.f32 %v1287_v32, %v1287_v32  ;;  %v448_v45 = vsel %vm390_vm5, %v431_v34, 0.0  ;;  %v396_v46 = vsel %vm390_vm5, %v1287_v32, 0.0 }
 0x1be   :  { %v392_v36 = vsel %vm390_vm5, %v1289_v33, 0.0  ;;  %v430_v37 = vmul.f32 %v1289_v33, %v1289_v33  ;;  %v445_v40 = vsel %vm390_vm5, %v429_v31, 0.0 }
 0x1bf   :  { %v393_v38 = vadd.f32 %v392_v36, %v391_v35  ;;  %v450_v51 = vsel %vm390_vm5, %v432_v41, 0.0 }
 0x1c0   :  { %v446_v42 = vsel %vm390_vm5, %v430_v37, 0.0 }
 0x1c1   :  { %v395_v43 = vadd.f32 %v394_v39, %v393_v38  ;;  %v447_v44 = vadd.f32 %v446_v42, %v445_v40 }
 0x1c2   :  { %v1308_v47 = vpop.f32.mrb[4].mxu1 }
 0x1c3   :  { %v449_v48 = vadd.f32 %v448_v45, %v447_v44  ;;  %v1310_v49 = vpop.f32.mrb[5].mxu1  ;;  %v397_v50 = vadd.f32 %v396_v46, %v395_v43  ;;  %v435_v58 = vmul.f32 %v1308_v47, %v1308_v47  ;;  %v402_v0 = vsel %vm390_vm5, %v1308_v47, 0.0 }
 0x1c4   :  { %v398_v52 = vsel %vm390_vm5, %v1310_v49, 0.0  ;;  %v433_v53 = vmul.f32 %v1310_v49, %v1310_v49  ;;  %v1317_v54 = vpop.f32.mrb[6].mxu1 }
 0x1c5   :  { %v399_v55 = vadd.f32 %v398_v52, %v397_v50  ;;  %v451_v56 = vadd.f32 %v450_v51, %v449_v48  ;;  %v1319_v57 = vpop.f32.mrb[7].mxu1  ;;  %v436_v1 = vmul.f32 %v1317_v54, %v1317_v54  ;;  %v456_v5 = vsel %vm390_vm5, %v435_v58, 0.0 }
 0x1c6   :  { %v452_v59 = vsel %vm390_vm5, %v433_v53, 0.0  ;;  %v400_v60 = vsel %vm390_vm5, %v1319_v57, 0.0  ;;  %v434_v61 = vmul.f32 %v1319_v57, %v1319_v57  ;;  %v404_v6 = vsel %vm390_vm5, %v1317_v54, 0.0 }
 0x1c7   :  { %v453_v62 = vadd.f32 %v452_v59, %v451_v56  ;;  %v401_v63 = vadd.f32 %v400_v60, %v399_v55  ;;  %v458_v11 = vsel %vm390_vm5, %v436_v1, 0.0  ;;  %v957_v59 = vld [vmem:[%s1487_s5] ss:$0 sm:$0xff] }
 0x1c8   :  { %v454_v2 = vsel %vm390_vm5, %v434_v61, 0.0 }
 0x1c9   :  { %v403_v3 = vadd.f32 %v402_v0, %v401_v63  ;;  %v455_v4 = vadd.f32 %v454_v2, %v453_v62 }
 0x1ca   :  { %v1336_v7 = vpop.f32.mrb[8].mxu1 }
 0x1cb   :  { %v457_v8 = vadd.f32 %v456_v5, %v455_v4  ;;  %v1338_v9 = vpop.f32.mrb[9].mxu1  ;;  %v405_v10 = vadd.f32 %v404_v6, %v403_v3  ;;  %v439_v18 = vmul.f32 %v1336_v7, %v1336_v7  ;;  %v410_v25 = vsel %vm390_vm5, %v1336_v7, 0.0 }
 0x1cc   :  { %v406_v12 = vsel %vm390_vm5, %v1338_v9, 0.0  ;;  %v437_v13 = vmul.f32 %v1338_v9, %v1338_v9  ;;  %v1345_v14 = vpop.f32.mrb[10].mxu1 }
 0x1cd   :  { %v407_v15 = vadd.f32 %v406_v12, %v405_v10  ;;  %v459_v16 = vadd.f32 %v458_v11, %v457_v8  ;;  %v1347_v17 = vpop.f32.mrb[11].mxu1  ;;  %v440_v26 = vmul.f32 %v1345_v14, %v1345_v14  ;;  %v464_v31 = vsel %vm390_vm5, %v439_v18, 0.0 }
 0x1ce   :  { %v460_v19 = vsel %vm390_vm5, %v437_v13, 0.0  ;;  %v408_v20 = vsel %vm390_vm5, %v1347_v17, 0.0  ;;  %v438_v22 = vmul.f32 %v1347_v17, %v1347_v17  ;;  %v412_v34 = vsel %vm390_vm5, %v1345_v14, 0.0 }
 0x1cf   :  { %v461_v23 = vadd.f32 %v460_v19, %v459_v16  ;;  %v409_v24 = vadd.f32 %v408_v20, %v407_v15  ;;  %v466_v39 = vsel %vm390_vm5, %v440_v26, 0.0 }
 0x1d0   :  { %v462_v27 = vsel %vm390_vm5, %v438_v22, 0.0 }
 0x1d1   :  { %v411_v28 = vadd.f32 %v410_v25, %v409_v24  ;;  %v463_v29 = vadd.f32 %v462_v27, %v461_v23 }
 0x1d2   :  { %v1364_v35 = vpop.f32.mrb[12].mxu1 }
 0x1d3   :  { %v465_v36 = vadd.f32 %v464_v31, %v463_v29  ;;  %v1366_v37 = vpop.f32.mrb[13].mxu1  ;;  %v413_v38 = vadd.f32 %v412_v34, %v411_v28  ;;  %v443_v46 = vmul.f32 %v1364_v35, %v1364_v35  ;;  %v418_v55 = vsel %vm390_vm5, %v1364_v35, 0.0 }
 0x1d4   :  { %v414_v40 = vsel %vm390_vm5, %v1366_v37, 0.0  ;;  %v441_v41 = vmul.f32 %v1366_v37, %v1366_v37  ;;  %v1373_v42 = vpop.f32.mrb[14].mxu1 }
 0x1d5   :  { %v415_v43 = vadd.f32 %v414_v40, %v413_v38  ;;  %v467_v44 = vadd.f32 %v466_v39, %v465_v36  ;;  %v1375_v45 = vpop.f32.mrb[15].mxu1  ;;  %v444_v56 = vmul.f32 %v1373_v42, %v1373_v42  ;;  %v472_v62 = vsel %vm390_vm5, %v443_v46, 0.0 }
 0x1d6   :  { %v468_v48 = vsel %vm390_vm5, %v441_v41, 0.0  ;;  %v416_v50 = vsel %vm390_vm5, %v1375_v45, 0.0  ;;  %v442_v51 = vmul.f32 %v1375_v45, %v1375_v45  ;;  %v420_v63 = vsel %vm390_vm5, %v1373_v42, 0.0 }
 0x1d7   :  { %v469_v52 = vadd.f32 %v468_v48, %v467_v44  ;;  %v417_v53 = vadd.f32 %v416_v50, %v415_v43  ;;  %v474_v5 = vsel %vm390_vm5, %v444_v56, 0.0 }
 0x1d8   :  { %v470_v58 = vsel %vm390_vm5, %v442_v51, 0.0 }
 0x1d9   :  { %v419_v60 = vadd.f32 %v418_v55, %v417_v53  ;;  %v471_v61 = vadd.f32 %v470_v58, %v469_v52 }
 0x1da   :  { %v1038_v0 = vpop.f32.mrb[16].mxu1 }
 0x1db   :  { %v421_v1 = vadd.f32 %v420_v63, %v419_v60  ;;  %v473_v2 = vadd.f32 %v472_v62, %v471_v61  ;;  %v743_v3 = vadd.f32 %v1038_v0, %v957_v59  ;;  %v734_v4 = vpop.f32.mrb[17].mxu1 }
 0x1dc   :  { %v735_v6 = vadd.f32 %v957_v59, %v734_v4  ;;  %v1039_v8 = vpop.f32.mrb[18].mxu1 }
 0x1dd   :  { %v422_v10 = vrot.slane %v421_v1, 4  ;;  %v475_v11 = vadd.f32 %v474_v5, %v473_v2  ;;  %v746_v12 = vadd.f32 %v1039_v8, %v957_v59  ;;  %v737_v13 = vpop.f32.mrb[19].mxu1  ;;  %v751_v19 = vmax.f32 %v743_v3, 0.0 }
 0x1de   :  { %v738_v15 = vadd.f32 %v957_v59, %v737_v13  ;;  %v749_v22 = vmax.f32 %v735_v6, 0.0 }
 0x1df   :  { %v423_v16 = vadd.f32 %v422_v10, %v421_v1  ;;  %v476_v18 = vrot.slane %v475_v11, 4  ;;  %v752_v20 = vmax.f32 %v746_v12, 0.0 }
 0x1e0   :  { %v750_v23 = vmax.f32 %v738_v15, 0.0 }
 0x1e1   :  { %v424_v24 = vrot.slane %v423_v16, 2  ;;  %v477_v25 = vadd.f32 %v476_v18, %v475_v11  ;;  %v754_v26 = vpack.c.bf16 %v752_v20, %v751_v19 }
 0x1e2   :  { %v753_v27 = vpack.c.bf16 %v750_v23, %v749_v22 }
 0x1e3   :  { %v425_v28 = vadd.f32 %v424_v24, %v423_v16  ;;  %v478_v29 = vrot.slane %v477_v25, 2 }
 0x1e4   :  { %1042 = vmatprep.mubr.msk.bf16.mxu0 %vm763_vm6, %v753_v27 }
 0x1e5   :  { %v426_v31 = vrot.slane %v425_v28, 1  ;;  %v479_v34 = vadd.f32 %v478_v29, %v477_v25  ;;  %1043 = vmatmul.mubr.msk.bf16.vlgmr.msra.gmra.mrb[20].mxu0 %vm763_vm6, %v754_v26 }
 0x1e7   :  { %v427_v36 = vadd.f32 %v426_v31, %v425_v28  ;;  %v480_v38 = vrot.slane %v479_v34, 1 }
 0x1e9   :  { %v428_v39 = vmul.f32 0.0078125, %v427_v36  ;;  %v481_v40 = vadd.f32 %v480_v38, %v479_v34 }
 0x1eb   :  { %v482_v41 = vmul.f32 0.0078125, %v481_v40  ;;  %v483_v43 = vmul.f32 %v428_v39, %v428_v39  ;;  %v498_v44 = vsub.f32 %v1375_v45, %v428_v39  ;;  %v485_v46 = vsub.f32 %v1283_v21, %v428_v39 }
 0x1ec   :  { %v486_v48 = vsub.f32 %v1289_v33, %v428_v39  ;;  %v487_v50 = vsub.f32 %v1281_v30, %v428_v39  ;;  %v488_v51 = vsub.f32 %v1287_v32, %v428_v39  ;;  %v489_v52 = vsub.f32 %v1310_v49, %v428_v39 }
 0x1ed   :  { %v484_v53 = vsub.f32 %v482_v41, %v483_v43  ;;  %v490_v55 = vsub.f32 %v1319_v57, %v428_v39  ;;  %v491_v56 = vsub.f32 %v1308_v47, %v428_v39  ;;  %v492_v58 = vsub.f32 %v1317_v54, %v428_v39  ;;  %v950_v47 = vld [vmem:[%s1489_s7] ss:$0 sm:$0xff]  ;;  %s1117_s7 = smov [#allocation2]  }
 0x1ee   :  { %v493_v59 = vsub.f32 %v1338_v9, %v428_v39  ;;  %v494_v45 = vsub.f32 %v1347_v17, %v428_v39  ;;  %v495_v21 = vsub.f32 %v1336_v7, %v428_v39  ;;  %v496_v33 = vsub.f32 %v1345_v14, %v428_v39  ;;  %v951_v7 = vld [vmem:[%s1490_s8] ss:$0 sm:$0xff]  ;;  %s898_s8 = sshll.u32 %s1117_s7, 4  ;;  %s899_s8 = int_to_ptr.vmem [resolvable:$true] %s898_s8 }
 0x1ef   :  { %v501_v30 = vadd.f32 1e-05, %v484_v53  ;;  %v497_v32 = vsub.f32 %v1366_v37, %v428_v39  ;;  %v499_v49 = vsub.f32 %v1364_v35, %v428_v39  ;;  %v500_v60 = vsub.f32 %v1373_v42, %v428_v39  ;;  %s1068_s20 = scalar_lea.vmem %s899_s8, 2048  ;;  %p1073_p1 = scmp.lt.s32.totalorder %s899_s8, %s899_s8 }
 0x1f0   :  { %p1069_p0 = scmp.ne.s32.totalorder %s899_s8, %s1068_s20  ;;  %p1074_p2 = scmp.lt.s32.totalorder %s1068_s20, %s1068_s20 }
 0x1f1   :  { %1064 = vrsqrt.f32 %v501_v30 }
 0x1f2   :  { %p1075_p3 = por %p1074_p2, %p1073_p1 }
 0x1f4   :  { %p1076_p4 = pnand %p1075_p3, %p1069_p0 }
 0x1fb   :  { %v1065_v57 = vpop.eup %1064 }
 0x1fc   :  { %v516_v54 = vmul.f32 %v1065_v57, %v498_v44  ;;  %v503_v9 = vmul.f32 %v1065_v57, %v485_v46  ;;  %v504_v17 = vmul.f32 %v1065_v57, %v486_v48  ;;  %v505_v61 = vmul.f32 %v1065_v57, %v487_v50 }
 0x1fd   :  { %v506_v14 = vmul.f32 %v1065_v57, %v488_v51  ;;  %v507_v37 = vmul.f32 %v1065_v57, %v489_v52  ;;  %v508_v62 = vmul.f32 %v1065_v57, %v490_v55  ;;  %v509_v35 = vmul.f32 %v1065_v57, %v491_v56 }
 0x1fe   :  { %v539_v63 = vmul.f32 %v950_v47, %v516_v54  ;;  %v510_v42 = vmul.f32 %v1065_v57, %v492_v58  ;;  %v511_v0 = vmul.f32 %v1065_v57, %v493_v59  ;;  %v512_v1 = vmul.f32 %v1065_v57, %v494_v45 }
 0x1ff   :  { %v513_v2 = vmul.f32 %v1065_v57, %v495_v21  ;;  %v514_v3 = vmul.f32 %v1065_v57, %v496_v33  ;;  %v515_v4 = vmul.f32 %v1065_v57, %v497_v32  ;;  %v517_v5 = vmul.f32 %v1065_v57, %v499_v49 }
 0x200   :  { %v562_v6 = vadd.f32 %v951_v7, %v539_v63  ;;  %v518_v8 = vmul.f32 %v1065_v57, %v500_v60  ;;  %v526_v10 = vmul.f32 %v950_v47, %v503_v9  ;;  %v527_v11 = vmul.f32 %v950_v47, %v504_v17 }
 0x201   :  { %v528_v12 = vmul.f32 %v950_v47, %v505_v61  ;;  %v529_v13 = vmul.f32 %v950_v47, %v506_v14  ;;  %v530_v15 = vmul.f32 %v950_v47, %v507_v37  ;;  %v531_v16 = vmul.f32 %v950_v47, %v508_v62 }
 0x202   :  { %v578_v18 = vmax.f32 %v562_v6, 0.0  ;;  %v532_v19 = vmul.f32 %v950_v47, %v509_v35  ;;  %v533_v20 = vmul.f32 %v950_v47, %v510_v42  ;;  %v534_v22 = vmul.f32 %v950_v47, %v511_v0 }
 0x203   :  { %v535_v23 = vmul.f32 %v950_v47, %v512_v1  ;;  %v536_v24 = vmul.f32 %v950_v47, %v513_v2  ;;  %v537_v25 = vmul.f32 %v950_v47, %v514_v3  ;;  %v538_v26 = vmul.f32 %v950_v47, %v515_v4 }
 0x204   :  { %594 = vst.msk [vmem:[#allocation2 + $0x68] sm:$0xff] %vm390_vm5, %v578_v18  ;;  %v540_v27 = vmul.f32 %v950_v47, %v517_v5  ;;  %v541_v28 = vmul.f32 %v950_v47, %v518_v8  ;;  %v549_v29 = vadd.f32 %v951_v7, %v526_v10  ;;  %v550_v31 = vadd.f32 %v951_v7, %v527_v11 }
 0x205   :  { %v551_v34 = vadd.f32 %v951_v7, %v528_v12  ;;  %v552_v36 = vadd.f32 %v951_v7, %v529_v13  ;;  %v553_v38 = vadd.f32 %v951_v7, %v530_v15  ;;  %v554_v39 = vadd.f32 %v951_v7, %v531_v16 }
 0x206   :  { %v555_v40 = vadd.f32 %v951_v7, %v532_v19  ;;  %v556_v41 = vadd.f32 %v951_v7, %v533_v20  ;;  %v557_v43 = vadd.f32 %v951_v7, %v534_v22  ;;  %v558_v44 = vadd.f32 %v951_v7, %v535_v23 }
 0x207   :  { %v559_v46 = vadd.f32 %v951_v7, %v536_v24  ;;  %v560_v48 = vadd.f32 %v951_v7, %v537_v25  ;;  %v561_v50 = vadd.f32 %v951_v7, %v538_v26  ;;  %v563_v51 = vadd.f32 %v951_v7, %v540_v27 }
 0x208   :  { %v564_v52 = vadd.f32 %v951_v7, %v541_v28  ;;  %v565_v53 = vmax.f32 %v549_v29, 0.0  ;;  %v566_v55 = vmax.f32 %v550_v31, 0.0  ;;  %v567_v56 = vmax.f32 %v551_v34, 0.0 }
 0x209   :  { %v568_v58 = vmax.f32 %v552_v36, 0.0  ;;  %v569_v59 = vmax.f32 %v553_v38, 0.0  ;;  %v570_v45 = vmax.f32 %v554_v39, 0.0  ;;  %v571_v21 = vmax.f32 %v555_v40, 0.0 }
 0x20a   :  { %v572_v33 = vmax.f32 %v556_v41, 0.0  ;;  %v573_v30 = vmax.f32 %v557_v43, 0.0  ;;  %v574_v32 = vmax.f32 %v558_v44, 0.0  ;;  %v575_v49 = vmax.f32 %v559_v46, 0.0  ;;  %581 = vst.msk [vmem:[#allocation2] sm:$0xff] %vm390_vm5, %v565_v53  ;;  %582 = vst.msk [vmem:[#allocation2 + $0x8] sm:$0xff] %vm390_vm5, %v566_v55 }
 0x20b   :  { %583 = vst.msk [vmem:[#allocation2 + $0x10] sm:$0xff] %vm390_vm5, %v567_v56  ;;  %v576_v60 = vmax.f32 %v560_v48, 0.0  ;;  %v577_v57 = vmax.f32 %v561_v50, 0.0  ;;  %v579_v47 = vmax.f32 %v563_v51, 0.0  ;;  %v580_v54 = vmax.f32 %v564_v52, 0.0  ;;  %584 = vst.msk [vmem:[#allocation2 + $0x18] sm:$0xff] %vm390_vm5, %v568_v58 }
 0x20c   :  { %585 = vst.msk [vmem:[#allocation2 + $0x20] sm:$0xff] %vm390_vm5, %v569_v59  ;;  %586 = vst.msk [vmem:[#allocation2 + $0x28] sm:$0xff] %vm390_vm5, %v570_v45 }
 0x20d   :  { %587 = vst.msk [vmem:[#allocation2 + $0x30] sm:$0xff] %vm390_vm5, %v571_v21  ;;  %588 = vst.msk [vmem:[#allocation2 + $0x38] sm:$0xff] %vm390_vm5, %v572_v33 }
 0x20e   :  { %589 = vst.msk [vmem:[#allocation2 + $0x40] sm:$0xff] %vm390_vm5, %v573_v30  ;;  %590 = vst.msk [vmem:[#allocation2 + $0x48] sm:$0xff] %vm390_vm5, %v574_v32 }
 0x20f   :  { %591 = vst.msk [vmem:[#allocation2 + $0x50] sm:$0xff] %vm390_vm5, %v575_v49  ;;  %592 = vst.msk [vmem:[#allocation2 + $0x58] sm:$0xff] %vm390_vm5, %v576_v60 }
 0x210   :  { %593 = vst.msk [vmem:[#allocation2 + $0x60] sm:$0xff] %vm390_vm5, %v577_v57  ;;  %595 = vst.msk [vmem:[#allocation2 + $0x70] sm:$0xff] %vm390_vm5, %v579_v47 }
 0x211   :  { %596 = vst.msk [vmem:[#allocation2 + $0x78] sm:$0xff] %vm390_vm5, %v580_v54 }
 0x212   :  { %1079 = shalt.err (!%p1076_p4)
}
 0x213   :  { %s1080_s23 = scalar_lea.hbm %s1494_s12, 2048 }
 0x214   :  { %p1081_p5 = scmp.ne.s32.totalorder %s1494_s12, %s1080_s23  ;;  %p1084_p6 = scmp.lt.u32.totalorder %s1080_s23, %s1494_s12 }
 0x216   :  { %p1086_p7 = pnand %p1084_p6, %p1081_p5 }
 0x218   :  { %1089 = shalt.err (!%p1086_p7)
}
 0x219   :  { %s1118_s28 = smov 128   ;;  %s1119_s29 = smov 8   ;;  %v963_v46 = vld [vmem:[%s1492_s10] ss:$0 sm:$0xff] }
 0x21a   :  { %904 = dma.vmem_to_hbm [thread:$0]  %s899_s8, 2048, %s1494_s12, [#allocation3], %s1118_s28, %s1118_s28, %s1119_s29  }
 0x21b   :  { %v964_v53 = vld [vmem:[%s1493_s11] ss:$0 sm:$0xff]  ;;  %s1120_s17 = smov [#allocation4]  }
 0x21c   :  { %s910_s2 = sshll.u32 %s1120_s17, 4  ;;  %s911_s2 = int_to_ptr.vmem [resolvable:$true] %s910_s2 }
 0x21d   :  { %s1090_s10 = scalar_lea.vmem %s911_s2, 512  ;;  %p1095_p9 = scmp.lt.s32.totalorder %s911_s2, %s911_s2 }
 0x21e   :  { %p1091_p8 = scmp.ne.s32.totalorder %s911_s2, %s1090_s10  ;;  %p1096_p10 = scmp.lt.s32.totalorder %s1090_s10, %s1090_s10 }
 0x220   :  { %p1097_p11 = por %p1096_p10, %p1095_p9 }
 0x222   :  { %p1098_p12 = pnand %p1097_p11, %p1091_p8 }
 0x2b8   :  { %v1044_v9 = vpop.f32.mrb[20].mxu0 }
 0x2b9   :  { %v804_v17 = vpop.f32.mrb[21].mxu0  ;;  %v835_v37 = vmul.f32 %v1044_v9, %v1044_v9  ;;  %v822_v0 = vsel %vm390_vm5, %v1044_v9, 0.0 }
 0x2ba   :  { %v833_v61 = vmul.f32 %v804_v17, %v804_v17  ;;  %v1045_v7 = vpop.f32.mrb[22].mxu0  ;;  %v819_v62 = vsel %vm390_vm5, %v804_v17, 0.0 }
 0x2bb   :  { %v807_v14 = vpop.f32.mrb[23].mxu0  ;;  %v836_v2 = vmul.f32 %v1045_v7, %v1045_v7  ;;  %v840_v6 = vsel %vm390_vm5, %v835_v37, 0.0  ;;  %v824_v8 = vsel %vm390_vm5, %v1045_v7, 0.0 }
 0x2bc   :  { %v820_v35 = vsel %vm390_vm5, %v807_v14, 0.0  ;;  %v834_v63 = vmul.f32 %v807_v14, %v807_v14  ;;  %v837_v1 = vsel %vm390_vm5, %v833_v61, 0.0 }
 0x2bd   :  { %v821_v42 = vadd.f32 %v820_v35, %v819_v62  ;;  %v842_v12 = vsel %vm390_vm5, %v836_v2, 0.0 }
 0x2be   :  { %v838_v3 = vsel %vm390_vm5, %v834_v63, 0.0 }
 0x2bf   :  { %v823_v4 = vadd.f32 %v822_v0, %v821_v42  ;;  %v839_v5 = vadd.f32 %v838_v3, %v837_v1 }
 0x2c1   :  { %v825_v10 = vadd.f32 %v824_v8, %v823_v4  ;;  %v841_v11 = vadd.f32 %v840_v6, %v839_v5 }
 0x2c3   :  { %v826_v13 = vrot.slane %v825_v10, 4  ;;  %v843_v15 = vadd.f32 %v842_v12, %v841_v11 }
 0x2c5   :  { %v827_v16 = vadd.f32 %v826_v13, %v825_v10  ;;  %v844_v18 = vrot.slane %v843_v15, 4 }
 0x2c7   :  { %v828_v19 = vrot.slane %v827_v16, 2  ;;  %v845_v20 = vadd.f32 %v844_v18, %v843_v15 }
 0x2c9   :  { %v829_v22 = vadd.f32 %v828_v19, %v827_v16  ;;  %v846_v23 = vrot.slane %v845_v20, 2 }
 0x2cb   :  { %v830_v24 = vrot.slane %v829_v22, 1  ;;  %v847_v25 = vadd.f32 %v846_v23, %v845_v20 }
 0x2cd   :  { %v831_v26 = vadd.f32 %v830_v24, %v829_v22  ;;  %v848_v27 = vrot.slane %v847_v25, 1 }
 0x2cf   :  { %v832_v28 = vmul.f32 0.03125, %v831_v26  ;;  %v849_v29 = vadd.f32 %v848_v27, %v847_v25 }
 0x2d1   :  { %v850_v31 = vmul.f32 0.03125, %v849_v29  ;;  %v851_v34 = vmul.f32 %v832_v28, %v832_v28  ;;  %v853_v36 = vsub.f32 %v804_v17, %v832_v28  ;;  %v854_v38 = vsub.f32 %v807_v14, %v832_v28 }
 0x2d2   :  { %v855_v39 = vsub.f32 %v1044_v9, %v832_v28  ;;  %v856_v40 = vsub.f32 %v1045_v7, %v832_v28 }
 0x2d3   :  { %v852_v41 = vsub.f32 %v850_v31, %v851_v34 }
 0x2d5   :  { %v857_v43 = vadd.f32 1e-05, %v852_v41 }
 0x2d7   :  { %1066 = vrsqrt.f32 %v857_v43 }
 0x2e1   :  { %v1067_v44 = vpop.eup %1066 }
 0x2e2   :  { %v859_v48 = vmul.f32 %v1067_v44, %v853_v36  ;;  %v860_v50 = vmul.f32 %v1067_v44, %v854_v38  ;;  %v861_v51 = vmul.f32 %v1067_v44, %v855_v39  ;;  %v862_v52 = vmul.f32 %v1067_v44, %v856_v40 }
 0x2e4   :  { %v870_v55 = vmul.f32 %v963_v46, %v859_v48  ;;  %v871_v56 = vmul.f32 %v963_v46, %v860_v50  ;;  %v872_v58 = vmul.f32 %v963_v46, %v861_v51  ;;  %v873_v59 = vmul.f32 %v963_v46, %v862_v52 }
 0x2e6   :  { %v881_v45 = vadd.f32 %v964_v53, %v870_v55  ;;  %v882_v21 = vadd.f32 %v964_v53, %v871_v56  ;;  %v883_v33 = vadd.f32 %v964_v53, %v872_v58  ;;  %v884_v30 = vadd.f32 %v964_v53, %v873_v59 }
 0x2e8   :  { %v885_v32 = vmax.f32 %v881_v45, 0.0  ;;  %v886_v49 = vmax.f32 %v882_v21, 0.0  ;;  %v887_v60 = vmax.f32 %v883_v33, 0.0  ;;  %v888_v57 = vmax.f32 %v884_v30, 0.0 }
 0x2ea   :  { %890 = vst.msk [vmem:[#allocation4 + $0x8] sm:$0xff] %vm390_vm5, %v886_v49  ;;  %889 = vst.msk [vmem:[#allocation4] sm:$0xff] %vm390_vm5, %v885_v32 }
 0x2eb   :  { %891 = vst.msk [vmem:[#allocation4 + $0x10] sm:$0xff] %vm390_vm5, %v887_v60  ;;  %892 = vst.msk [vmem:[#allocation4 + $0x18] sm:$0xff] %vm390_vm5, %v888_v57 }
 0x2ec   :  { %1101 = shalt.err (!%p1098_p12)
}
 0x2ed   :  { %s1102_s3 = scalar_lea.hbm %s1495_s13, 512 }
 0x2ee   :  { %p1103_p13 = scmp.ne.s32.totalorder %s1495_s13, %s1102_s3  ;;  %p1106_p0 = scmp.lt.u32.totalorder %s1102_s3, %s1495_s13 }
 0x2f0   :  { %p1108_p1 = pnand %p1106_p0, %p1103_p13 }
 0x2f2   :  { %1111 = shalt.err (!%p1108_p1)
}
 0x2f3   :  { %916 = dma.vmem_to_hbm [thread:$0]  %s911_s2, 512, %s1495_s13, [#allocation5], %s1118_s28, %s1118_s28, %s1119_s29  }
 0x2f4   :  { %1112 = dma.done.wait [#allocation3], 2048  }
 0x2f5   :  { %1113 = vsyncadd [#allocation3], 4294965248 }
 0x2f6   :  { %1114 = dma.done.wait [#allocation5], 512  }
 0x2f7   :  { %1115 = vsyncadd [#allocation5], 4294966784 }
 0x2f8   :  { %923 = vsyncpa [#allocation3], 1 }
 0x2f9   :  { %924 = vsyncpa [#allocation5], 1 }

</bundles_post_ra>
